<compile_context>
chip_gen: v6e
topology: v6e:2x2x1
jax: 0.10.0
libtpu: 0.0.40
codegen_flags: <defaults>
</compile_context>

<pallas_src>
import jax
import jax.numpy as jnp
from jax.experimental import pallas as pl
from jax.experimental.pallas import tpu as pltpu


LANE = 128           # lane-dense output width
LN_EPS = 1e-5        # torch.nn.LayerNorm default


def _round_up(x, m):
    return ((x + m - 1) // m) * m


def _cdiv(a, b):
    return (a + b - 1) // b


# ----------------------------- Pallas kernel --------------------------------


def _layernorm_f32(x, gamma, beta, eps=LN_EPS):
    mu = jnp.mean(x, axis=-1, keepdims=True)
    var = jnp.mean((x - mu) ** 2, axis=-1, keepdims=True)
    return (x - mu) * jax.lax.rsqrt(var + eps) * gamma + beta


def _fused_kernel(cls_ref,
                  pw_ref, pb_ref,
                  w0_ref, b0_ref, g0_ref, be0_ref,
                  w1_ref, b1_ref, g1_ref, be1_ref,
                  wf_ref, bf_ref,
                  out_ref):
    """Fused BERT-pooler + QAGNN decoder MLP for one row tile."""
    # --- BERT pooler: sent = tanh(cls @ W_pool + b_pool) ---------------------
    # cls tile arrives as bf16 (half-width DMA) and feeds the MXU directly;
    # accumulation is f32, tanh runs on the EUP in f32.
    # TODO(synk): the PyTorch reference is fp32 end-to-end; keep these matmuls
    #             f32 if strict numerical parity is required.
    sent = jnp.tanh(
        jnp.dot(cls_ref[...], pw_ref[...],
                preferred_element_type=jnp.float32) + pb_ref[...])

    # --- QAGNN decoder -------------------------------------------------------
    # dropout_fc is eval-mode identity.
    # TODO(synk): nn.Dropout is stochastic in train mode; would need
    #             pltpu.prng_seed/prng_random_bits masks for training parity.
    h = jnp.dot(sent.astype(jnp.bfloat16), w0_ref[...],
                preferred_element_type=jnp.float32) + b0_ref[...]
    h = _layernorm_f32(h, g0_ref[...], be0_ref[...])
    h = jnp.dot(h.astype(jnp.bfloat16), w1_ref[...],
                preferred_element_type=jnp.float32) + b1_ref[...]
    h = _layernorm_f32(h, g1_ref[...], be1_ref[...])

    # Final (fc_dim -> 1) projection as VPU multiply + lane reduction
    # (an N=1 MXU matmul would waste nearly all systolic columns).
    # The scalar bias lives in SMEM (no wasted (8,128) VMEM tile).
    logit = jnp.sum(h * wf_ref[...], axis=-1, keepdims=True) + bf_ref[0, 0]

    # Lane-dense writeback: broadcast the per-row scalar across 128 lanes so
    # the store is an unmasked full-width vst; the wrapper slices lane 0.
    # (Repacking rows into one (8,128) block would cut output HBM traffic
    #  128x; only worthwhile at large batch*num_choice.)
    out_ref[...] = jnp.broadcast_to(logit, out_ref.shape)


# ------------------------------ Pallas wrapper -------------------------------


def _choose_tiling(n_rows, cap=512):
    """Pick the row tile / padded row count.

    Tiles are as large as possible (amortize per-step overhead + MXU weight
    push); once a tile would exceed 256 rows we prefer an even grid so both
    v7x TensorCores get work.  v5e/v6e (single TC) simply get the max tile.
    """
    n8 = _round_up(max(n_rows, 1), 8)
    if n8 <= cap:
        half = n8 // 2
        tile_m = half if (half >= 256 and half % 8 == 0) else n8
    else:
        steps = _cdiv(n8, cap)
        if steps % 2 == 1:
            steps += 1                     # even grid -> megacore-friendly
        tile_m = _round_up(_cdiv(n8, steps), 8)
    n_pad = _round_up(n8, tile_m)
    return tile_m, n_pad


def lm_qagnn_logits(cls_hidden, params):
    """cls_hidden: (n, sent_dim)  ->  logits: (n,) f32 via one fused kernel."""
    n, sent_dim = cls_hidden.shape
    fc_dim = params["fc_w0"].shape[1]

    tile_m, n_pad = _choose_tiling(n)
    grid_len = n_pad // tile_m

    # cls_hidden is the only operand streamed every grid step: keep it bf16.
    cls_hidden = cls_hidden.astype(jnp.bfloat16)
    if n_pad != n:
        cls_hidden = jnp.pad(cls_hidden, ((0, n_pad - n), (0, 0)))

    def rows(i):        # activation / output tiles march down the row axis
        return (i, 0)

    def pinned(i):      # weights & norm params stay resident (constant block)
        return (0, 0)

    # Constant-index blocks need no double buffer; streamed cls tile gets an
    # extra buffer once the grid is long enough to expose its DMA.
    resident = pl.Buffered(1)
    n_cls_bufs = 3 if grid_len >= 3 else 2
    stream = pl.Buffered(n_cls_bufs)

    in_specs = [
        pl.BlockSpec((tile_m, sent_dim), rows, pipeline_mode=stream),        # cls (bf16)
        pl.BlockSpec((sent_dim, sent_dim), pinned, pipeline_mode=resident),  # pool_w
        pl.BlockSpec((1, sent_dim), pinned, pipeline_mode=resident),         # pool_b
        pl.BlockSpec((sent_dim, fc_dim), pinned, pipeline_mode=resident),    # fc_w0
        pl.BlockSpec((1, fc_dim), pinned, pipeline_mode=resident),           # fc_b0
        pl.BlockSpec((1, fc_dim), pinned, pipeline_mode=resident),           # ln0_g
        pl.BlockSpec((1, fc_dim), pinned, pipeline_mode=resident),           # ln0_b
        pl.BlockSpec((fc_dim, fc_dim), pinned, pipeline_mode=resident),      # fc_w1
        pl.BlockSpec((1, fc_dim), pinned, pipeline_mode=resident),           # fc_b1
        pl.BlockSpec((1, fc_dim), pinned, pipeline_mode=resident),           # ln1_g
        pl.BlockSpec((1, fc_dim), pinned, pipeline_mode=resident),           # ln1_b
        pl.BlockSpec((1, fc_dim), pinned, pipeline_mode=resident),           # fc_wf row
        pl.BlockSpec(memory_space=pltpu.SMEM),                               # fc_bf scalar
    ]

    # VMEM budget from the actual footprint (+50% headroom +8 MiB), capped at
    # 48 MiB so the request also leaves compiler-scratch slack on v7x (64 MiB).
    pinned_bytes = 2 * (sent_dim * sent_dim + sent_dim * fc_dim + fc_dim * fc_dim)
    pinned_bytes += 4 * (sent_dim + 8 * fc_dim)
    stream_bytes = n_cls_bufs * tile_m * sent_dim * 2
    out_bytes = 2 * tile_m * LANE * 4
    vmem_limit = int(1.5 * (pinned_bytes + stream_bytes + out_bytes)) + (8 << 20)
    vmem_limit = max(16 << 20, min(vmem_limit, 48 << 20))

    out = pl.pallas_call(
        _fused_kernel,
        out_shape=jax.ShapeDtypeStruct((n_pad, LANE), jnp.float32),
        grid=(grid_len,),
        in_specs=in_specs,
        out_specs=pl.BlockSpec((tile_m, LANE), rows),
        compiler_params=pltpu.CompilerParams(
            dimension_semantics=("parallel",),          # megacore on v7x
            vmem_limit_bytes=vmem_limit,
        ),
    )(cls_hidden,
      params["pool_w"], params["pool_b"],
      params["fc_w0"], params["fc_b0"], params["ln0_g"], params["ln0_b"],
      params["fc_w1"], params["fc_b1"], params["ln1_g"], params["ln1_b"],
      params["fc_wf_row"], params["fc_bf"])

    return out[:n, 0]


# ------------------------------ model assembly -------------------------------


def init_params(key, vocab_size, sent_dim, fc_dim):
    ks = jax.random.split(key, 8)
    std = 0.02
    return {
        # TextEncoder stand-in: embedding table + BERT pooler head.
        # Embedding table stored bf16 so the streamed cls activations are
        # already half-width (they are cast to bf16 for the MXU anyway).
        "emb":    (jax.random.normal(ks[0], (vocab_size, sent_dim), jnp.float32) * std
                   ).astype(jnp.bfloat16),
        # Matmul weights stored bf16 (MXU inputs); everything else f32.
        "pool_w": (jax.random.normal(ks[1], (sent_dim, sent_dim), jnp.float32) * std
                   ).astype(jnp.bfloat16),
        "pool_b": jnp.zeros((1, sent_dim), jnp.float32),
        # QAGNN decoder MLP(sent_dim, fc_dim, 1, n_fc_layer=2, layer_norm=True)
        "fc_w0":  (jax.random.normal(ks[2], (sent_dim, fc_dim), jnp.float32) * std
                   ).astype(jnp.bfloat16),
        "fc_b0":  jnp.zeros((1, fc_dim), jnp.float32),
        "ln0_g":  jnp.ones((1, fc_dim), jnp.float32),
        "ln0_b":  jnp.zeros((1, fc_dim), jnp.float32),
        "fc_w1":  (jax.random.normal(ks[3], (fc_dim, fc_dim), jnp.float32) * std
                   ).astype(jnp.bfloat16),
        "fc_b1":  jnp.zeros((1, fc_dim), jnp.float32),
        "ln1_g":  jnp.ones((1, fc_dim), jnp.float32),
        "ln1_b":  jnp.zeros((1, fc_dim), jnp.float32),
        # Final Linear(fc_dim, 1) stored as a row vector for the lane reduction;
        # its scalar bias goes to SMEM.
        "fc_wf_row": jax.random.normal(ks[4], (1, fc_dim), jnp.float32) * std,
        "fc_bf":     jnp.zeros((1, 1), jnp.float32),
    }


def lm_qagnn_forward(params, input_ids, attention_mask):
    """
    input_ids:      (bs, nc, seq) int32
    attention_mask: (bs, nc, seq) int32  (kept for API parity; unused by pooler path)
    returns logits: (bs, nc) float32
    """
    bs, nc, seq = input_ids.shape
    flat_ids = input_ids.reshape(bs * nc, seq)

    # TextEncoder: gather ONLY the CLS-token embedding (never materialize the
    # (n, seq, sent_dim) hidden-state tensor).
    # TODO(synk): the pretrained transformer (AutoModel.from_pretrained) has no
    #             in-script Pallas equivalent; only the pooler head is faithful.
    cls_hidden = params["emb"][flat_ids[:, 0]]          # (bs*nc, sent_dim) bf16

    # Fused Pallas kernel: BERT pooler + dropout(identity) + MLP w/ LayerNorm.
    logits = lm_qagnn_logits(cls_hidden, params)         # (bs*nc,)

    return logits.reshape(bs, nc)


# ---------------------------------- main -------------------------------------


if __name__ == "__main__":
    key = jax.random.PRNGKey(0)
    k_ids, k_params = jax.random.split(key)

    bs, nc, seq = 2, 4, 8          # batch, num_choice, sequence length
    vocab_size, sent_dim, fc_dim = 64, 32, 32

    input_ids = jax.random.randint(k_ids, (bs, nc, seq), 0, vocab_size, dtype=jnp.int32)
    attention_mask = jnp.ones((bs, nc, seq), dtype=jnp.int32)

    params = init_params(k_params, vocab_size, sent_dim, fc_dim)

    logits = lm_qagnn_forward(params, input_ids, attention_mask)
    jax.block_until_ready(logits)
    assert logits.shape == (bs, nc) and logits.dtype == jnp.float32
    assert bool(jnp.all(jnp.isfinite(logits)))

    print("KERNEL_OK")
</pallas_src>

<mosaic_0001>
module attributes {stable_mosaic.version = 11 : i64} {
  func.func @_fused_kernel(%arg0: i32, %arg1: memref<8x32xbf16, #tpu.memory_space<vmem>>, %arg2: memref<32x32xbf16, #tpu.memory_space<vmem>>, %arg3: memref<1x32xf32, #tpu.memory_space<vmem>>, %arg4: memref<32x32xbf16, #tpu.memory_space<vmem>>, %arg5: memref<1x32xf32, #tpu.memory_space<vmem>>, %arg6: memref<1x32xf32, #tpu.memory_space<vmem>>, %arg7: memref<1x32xf32, #tpu.memory_space<vmem>>, %arg8: memref<32x32xbf16, #tpu.memory_space<vmem>>, %arg9: memref<1x32xf32, #tpu.memory_space<vmem>>, %arg10: memref<1x32xf32, #tpu.memory_space<vmem>>, %arg11: memref<1x32xf32, #tpu.memory_space<vmem>>, %arg12: memref<1x32xf32, #tpu.memory_space<vmem>>, %arg13: memref<1x1xf32, #tpu.memory_space<smem>>, %arg14: memref<8x128xf32, #tpu.memory_space<vmem>>) attributes {dimension_semantics = [#tpu.dimension_semantics<parallel>], iteration_bounds = array<i64: 1>, scalar_prefetch = 0 : i64, scratch_operands = 0 : i64, tpu.core_type = #tpu.core_type<tc>, window_params = [{pipeline_mode = #tpu.pipeline_mode<double_buffered>, transform_indices = @transform_0, window_bounds = array<i64: 8, 32>}, {pipeline_mode = #tpu.pipeline_mode<synchronous>, transform_indices = @transform_1, window_bounds = array<i64: 32, 32>}, {pipeline_mode = #tpu.pipeline_mode<synchronous>, transform_indices = @transform_2, window_bounds = array<i64: 1, 32>}, {pipeline_mode = #tpu.pipeline_mode<synchronous>, transform_indices = @transform_3, window_bounds = array<i64: 32, 32>}, {pipeline_mode = #tpu.pipeline_mode<synchronous>, transform_indices = @transform_4, window_bounds = array<i64: 1, 32>}, {pipeline_mode = #tpu.pipeline_mode<synchronous>, transform_indices = @transform_5, window_bounds = array<i64: 1, 32>}, {pipeline_mode = #tpu.pipeline_mode<synchronous>, transform_indices = @transform_6, window_bounds = array<i64: 1, 32>}, {pipeline_mode = #tpu.pipeline_mode<synchronous>, transform_indices = @transform_7, window_bounds = array<i64: 32, 32>}, {pipeline_mode = #tpu.pipeline_mode<synchronous>, transform_indices = @transform_8, window_bounds = array<i64: 1, 32>}, {pipeline_mode = #tpu.pipeline_mode<synchronous>, transform_indices = @transform_9, window_bounds = array<i64: 1, 32>}, {pipeline_mode = #tpu.pipeline_mode<synchronous>, transform_indices = @transform_10, window_bounds = array<i64: 1, 32>}, {pipeline_mode = #tpu.pipeline_mode<synchronous>, transform_indices = @transform_11, window_bounds = array<i64: 1, 32>}, {transform_indices = @transform_12, window_bounds = array<i64: 1, 1>}, {transform_indices = @transform_13, window_bounds = array<i64: 8, 128>}]} {
    %c0 = arith.constant 0 : index
    %c0_0 = arith.constant 0 : index
    %0 = vector.load %arg1[%c0, %c0_0] : memref<8x32xbf16, #tpu.memory_space<vmem>>, vector<8x32xbf16>
    %c0_1 = arith.constant 0 : index
    %c0_2 = arith.constant 0 : index
    %1 = vector.load %arg2[%c0_1, %c0_2] : memref<32x32xbf16, #tpu.memory_space<vmem>>, vector<32x32xbf16>
    %cst = arith.constant dense<0.000000e+00> : vector<8x32xf32>
    %2 = tpu.matmul %0, %1, %cst {dimension_numbers = #tpu.dot_dimension_numbers<[1], [0], [0], [1], [0, 0, 1, 1], [], []>} : vector<8x32xbf16>, vector<32x32xbf16>, vector<8x32xf32> -> vector<8x32xf32>
    %c0_3 = arith.constant 0 : index
    %c0_4 = arith.constant 0 : index
    %3 = vector.load %arg3[%c0_3, %c0_4] : memref<1x32xf32, #tpu.memory_space<vmem>>, vector<1x32xf32>
    %4 = vector.broadcast %3 : vector<1x32xf32> to vector<8x32xf32>
    %5 = arith.addf %2, %4 : vector<8x32xf32>
    %6 = math.tanh %5 : vector<8x32xf32>
    %7 = arith.truncf %6 : vector<8x32xf32> to vector<8x32xbf16>
    %c0_5 = arith.constant 0 : index
    %c0_6 = arith.constant 0 : index
    %8 = vector.load %arg4[%c0_5, %c0_6] : memref<32x32xbf16, #tpu.memory_space<vmem>>, vector<32x32xbf16>
    %cst_7 = arith.constant dense<0.000000e+00> : vector<8x32xf32>
    %9 = tpu.matmul %7, %8, %cst_7 {dimension_numbers = #tpu.dot_dimension_numbers<[1], [0], [0], [1], [0, 0, 1, 1], [], []>} : vector<8x32xbf16>, vector<32x32xbf16>, vector<8x32xf32> -> vector<8x32xf32>
    %c0_8 = arith.constant 0 : index
    %c0_9 = arith.constant 0 : index
    %10 = vector.load %arg5[%c0_8, %c0_9] : memref<1x32xf32, #tpu.memory_space<vmem>>, vector<1x32xf32>
    %11 = vector.broadcast %10 : vector<1x32xf32> to vector<8x32xf32>
    %12 = arith.addf %9, %11 : vector<8x32xf32>
    %c0_10 = arith.constant 0 : index
    %c0_11 = arith.constant 0 : index
    %13 = vector.load %arg6[%c0_10, %c0_11] : memref<1x32xf32, #tpu.memory_space<vmem>>, vector<1x32xf32>
    %c0_12 = arith.constant 0 : index
    %c0_13 = arith.constant 0 : index
    %14 = vector.load %arg7[%c0_12, %c0_13] : memref<1x32xf32, #tpu.memory_space<vmem>>, vector<1x32xf32>
    %cst_14 = arith.constant dense<0.000000e+00> : vector<8xf32>
    %15 = vector.multi_reduction <add>, %12, %cst_14 [1] : vector<8x32xf32> to vector<8xf32>
    %16 = vector.shape_cast %15 : vector<8xf32> to vector<8x1xf32>
    %cst_15 = arith.constant 3.200000e+01 : f32
    %17 = vector.broadcast %cst_15 : f32 to vector<8x1xf32>
    %18 = arith.divf %16, %17 : vector<8x1xf32>
    %19 = vector.broadcast %18 : vector<8x1xf32> to vector<8x32xf32>
    %20 = arith.subf %12, %19 : vector<8x32xf32>
    %21 = arith.mulf %20, %20 : vector<8x32xf32>
    %cst_16 = arith.constant dense<0.000000e+00> : vector<8xf32>
    %22 = vector.multi_reduction <add>, %21, %cst_16 [1] : vector<8x32xf32> to vector<8xf32>
    %23 = vector.shape_cast %22 : vector<8xf32> to vector<8x1xf32>
    %cst_17 = arith.constant 3.200000e+01 : f32
    %24 = vector.broadcast %cst_17 : f32 to vector<8x1xf32>
    %25 = arith.divf %23, %24 : vector<8x1xf32>
    %26 = vector.broadcast %18 : vector<8x1xf32> to vector<8x32xf32>
    %27 = arith.subf %12, %26 : vector<8x32xf32>
    %cst_18 = arith.constant 9.99999974E-6 : f32
    %28 = vector.broadcast %cst_18 : f32 to vector<8x1xf32>
    %29 = arith.addf %25, %28 : vector<8x1xf32>
    %30 = math.rsqrt %29 : vector<8x1xf32>
    %31 = vector.broadcast %30 : vector<8x1xf32> to vector<8x32xf32>
    %32 = arith.mulf %27, %31 : vector<8x32xf32>
    %33 = vector.broadcast %13 : vector<1x32xf32> to vector<8x32xf32>
    %34 = arith.mulf %32, %33 : vector<8x32xf32>
    %35 = vector.broadcast %14 : vector<1x32xf32> to vector<8x32xf32>
    %36 = arith.addf %34, %35 : vector<8x32xf32>
    %37 = arith.truncf %36 : vector<8x32xf32> to vector<8x32xbf16>
    %c0_19 = arith.constant 0 : index
    %c0_20 = arith.constant 0 : index
    %38 = vector.load %arg8[%c0_19, %c0_20] : memref<32x32xbf16, #tpu.memory_space<vmem>>, vector<32x32xbf16>
    %cst_21 = arith.constant dense<0.000000e+00> : vector<8x32xf32>
    %39 = tpu.matmul %37, %38, %cst_21 {dimension_numbers = #tpu.dot_dimension_numbers<[1], [0], [0], [1], [0, 0, 1, 1], [], []>} : vector<8x32xbf16>, vector<32x32xbf16>, vector<8x32xf32> -> vector<8x32xf32>
    %c0_22 = arith.constant 0 : index
    %c0_23 = arith.constant 0 : index
    %40 = vector.load %arg9[%c0_22, %c0_23] : memref<1x32xf32, #tpu.memory_space<vmem>>, vector<1x32xf32>
    %41 = vector.broadcast %40 : vector<1x32xf32> to vector<8x32xf32>
    %42 = arith.addf %39, %41 : vector<8x32xf32>
    %c0_24 = arith.constant 0 : index
    %c0_25 = arith.constant 0 : index
    %43 = vector.load %arg10[%c0_24, %c0_25] : memref<1x32xf32, #tpu.memory_space<vmem>>, vector<1x32xf32>
    %c0_26 = arith.constant 0 : index
    %c0_27 = arith.constant 0 : index
    %44 = vector.load %arg11[%c0_26, %c0_27] : memref<1x32xf32, #tpu.memory_space<vmem>>, vector<1x32xf32>
    %cst_28 = arith.constant dense<0.000000e+00> : vector<8xf32>
    %45 = vector.multi_reduction <add>, %42, %cst_28 [1] : vector<8x32xf32> to vector<8xf32>
    %46 = vector.shape_cast %45 : vector<8xf32> to vector<8x1xf32>
    %cst_29 = arith.constant 3.200000e+01 : f32
    %47 = vector.broadcast %cst_29 : f32 to vector<8x1xf32>
    %48 = arith.divf %46, %47 : vector<8x1xf32>
    %49 = vector.broadcast %48 : vector<8x1xf32> to vector<8x32xf32>
    %50 = arith.subf %42, %49 : vector<8x32xf32>
    %51 = arith.mulf %50, %50 : vector<8x32xf32>
    %cst_30 = arith.constant dense<0.000000e+00> : vector<8xf32>
    %52 = vector.multi_reduction <add>, %51, %cst_30 [1] : vector<8x32xf32> to vector<8xf32>
    %53 = vector.shape_cast %52 : vector<8xf32> to vector<8x1xf32>
    %cst_31 = arith.constant 3.200000e+01 : f32
    %54 = vector.broadcast %cst_31 : f32 to vector<8x1xf32>
    %55 = arith.divf %53, %54 : vector<8x1xf32>
    %56 = vector.broadcast %48 : vector<8x1xf32> to vector<8x32xf32>
    %57 = arith.subf %42, %56 : vector<8x32xf32>
    %cst_32 = arith.constant 9.99999974E-6 : f32
    %58 = vector.broadcast %cst_32 : f32 to vector<8x1xf32>
    %59 = arith.addf %55, %58 : vector<8x1xf32>
    %60 = math.rsqrt %59 : vector<8x1xf32>
    %61 = vector.broadcast %60 : vector<8x1xf32> to vector<8x32xf32>
    %62 = arith.mulf %57, %61 : vector<8x32xf32>
    %63 = vector.broadcast %43 : vector<1x32xf32> to vector<8x32xf32>
    %64 = arith.mulf %62, %63 : vector<8x32xf32>
    %65 = vector.broadcast %44 : vector<1x32xf32> to vector<8x32xf32>
    %66 = arith.addf %64, %65 : vector<8x32xf32>
    %c0_33 = arith.constant 0 : index
    %c0_34 = arith.constant 0 : index
    %67 = vector.load %arg12[%c0_33, %c0_34] : memref<1x32xf32, #tpu.memory_space<vmem>>, vector<1x32xf32>
    %68 = vector.broadcast %67 : vector<1x32xf32> to vector<8x32xf32>
    %69 = arith.mulf %66, %68 : vector<8x32xf32>
    %cst_35 = arith.constant dense<0.000000e+00> : vector<8xf32>
    %70 = vector.multi_reduction <add>, %69, %cst_35 [1] : vector<8x32xf32> to vector<8xf32>
    %71 = vector.shape_cast %70 : vector<8xf32> to vector<8x1xf32>
    %c0_36 = arith.constant 0 : index
    %c0_37 = arith.constant 0 : index
    %72 = memref.load %arg13[%c0_36, %c0_37] : memref<1x1xf32, #tpu.memory_space<smem>>
    %73 = vector.broadcast %72 : f32 to vector<8x1xf32>
    %74 = arith.addf %71, %73 : vector<8x1xf32>
    %75 = vector.shape_cast %74 : vector<8x1xf32> to vector<8x1xf32>
    %76 = vector.broadcast %75 : vector<8x1xf32> to vector<8x128xf32>
    %c0_38 = arith.constant 0 : index
    %c0_39 = arith.constant 0 : index
    %77 = vector.load %arg14[%c0_38, %c0_39] : memref<8x128xf32, #tpu.memory_space<vmem>>, vector<8x128xf32>
    tpu.vector_store %arg14[%c0_38, %c0_39], %76 {strides = array<i32>} : memref<8x128xf32, #tpu.memory_space<vmem>>, vector<8x128xf32>,
    return
  }
  func.func @transform_0(%arg0: i32) -> (i32, i32) {
    %c0_i32 = arith.constant 0 : i32
    %c0_i32_0 = arith.constant 0 : i32
    return %arg0, %c0_i32 : i32, i32
  }
  func.func @transform_1(%arg0: i32) -> (i32, i32) {
    %c0_i32 = arith.constant 0 : i32
    %c0_i32_0 = arith.constant 0 : i32
    %c0_i32_1 = arith.constant 0 : i32
    return %c0_i32, %c0_i32_0 : i32, i32
  }
  func.func @transform_2(%arg0: i32) -> (i32, i32) {
    %c0_i32 = arith.constant 0 : i32
    %c0_i32_0 = arith.constant 0 : i32
    %c0_i32_1 = arith.constant 0 : i32
    return %c0_i32, %c0_i32_0 : i32, i32
  }
  func.func @transform_3(%arg0: i32) -> (i32, i32) {
    %c0_i32 = arith.constant 0 : i32
    %c0_i32_0 = arith.constant 0 : i32
    %c0_i32_1 = arith.constant 0 : i32
    return %c0_i32, %c0_i32_0 : i32, i32
  }
  func.func @transform_4(%arg0: i32) -> (i32, i32) {
    %c0_i32 = arith.constant 0 : i32
    %c0_i32_0 = arith.constant 0 : i32
    %c0_i32_1 = arith.constant 0 : i32
    return %c0_i32, %c0_i32_0 : i32, i32
  }
  func.func @transform_5(%arg0: i32) -> (i32, i32) {
    %c0_i32 = arith.constant 0 : i32
    %c0_i32_0 = arith.constant 0 : i32
    %c0_i32_1 = arith.constant 0 : i32
    return %c0_i32, %c0_i32_0 : i32, i32
  }
  func.func @transform_6(%arg0: i32) -> (i32, i32) {
    %c0_i32 = arith.constant 0 : i32
    %c0_i32_0 = arith.constant 0 : i32
    %c0_i32_1 = arith.constant 0 : i32
    return %c0_i32, %c0_i32_0 : i32, i32
  }
  func.func @transform_7(%arg0: i32) -> (i32, i32) {
    %c0_i32 = arith.constant 0 : i32
    %c0_i32_0 = arith.constant 0 : i32
    %c0_i32_1 = arith.constant 0 : i32
    return %c0_i32, %c0_i32_0 : i32, i32
  }
  func.func @transform_8(%arg0: i32) -> (i32, i32) {
    %c0_i32 = arith.constant 0 : i32
    %c0_i32_0 = arith.constant 0 : i32
    %c0_i32_1 = arith.constant 0 : i32
    return %c0_i32, %c0_i32_0 : i32, i32
  }
  func.func @transform_9(%arg0: i32) -> (i32, i32) {
    %c0_i32 = arith.constant 0 : i32
    %c0_i32_0 = arith.constant 0 : i32
    %c0_i32_1 = arith.constant 0 : i32
    return %c0_i32, %c0_i32_0 : i32, i32
  }
  func.func @transform_10(%arg0: i32) -> (i32, i32) {
    %c0_i32 = arith.constant 0 : i32
    %c0_i32_0 = arith.constant 0 : i32
    %c0_i32_1 = arith.constant 0 : i32
    return %c0_i32, %c0_i32_0 : i32, i32
  }
  func.func @transform_11(%arg0: i32) -> (i32, i32) {
    %c0_i32 = arith.constant 0 : i32
    %c0_i32_0 = arith.constant 0 : i32
    %c0_i32_1 = arith.constant 0 : i32
    return %c0_i32, %c0_i32_0 : i32, i32
  }
  func.func @transform_12(%arg0: i32) -> (i32, i32) {
    %c0_i32 = arith.constant 0 : i32
    %c0_i32_0 = arith.constant 0 : i32
    %c0_i32_1 = arith.constant 0 : i32
    return %c0_i32, %c0_i32_0 : i32, i32
  }
  func.func @transform_13(%arg0: i32) -> (i32, i32) {
    %c0_i32 = arith.constant 0 : i32
    %c0_i32_0 = arith.constant 0 : i32
    return %arg0, %c0_i32 : i32, i32
  }
}

</mosaic_0001>

<bundles_post_ra>
// kernel: tpu_custom_call.1
= control target key start
LH: loop header
LB: loop body
LE: loop exit
PB: predicated region body
PF: predicated region fallthrough
CT: control target
= control target key end

     0   :  { %19 = vsyncpa [#allocation4], 0  ;;  %s711_s0 = inlined_call_operand.hbm [shape: bf16[8,32], index: 0, kind: input, shape index: {}]   ;;  %s712_s1 = inlined_call_operand.hbm [shape: bf16[32,32], index: 1, kind: input, shape index: {}]   ;;  %s713_s2 = inlined_call_operand.vmem [shape: f32[1,32], index: 2, kind: input, shape index: {}]   ;;  %s714_s3 = inlined_call_operand.hbm [shape: bf16[32,32], index: 3, kind: input, shape index: {}]   ;;  %s715_s4 = inlined_call_operand.vmem [shape: f32[1,32], index: 4, kind: input, shape index: {}]   ;;  %s716_s5 = inlined_call_operand.vmem [shape: f32[1,32], index: 5, kind: input, shape index: {}]   ;;  %s717_s6 = inlined_call_operand.vmem [shape: f32[1,32], index: 6, kind: input, shape index: {}]   ;;  %s718_s7 = inlined_call_operand.hbm [shape: bf16[32,32], index: 7, kind: input, shape index: {}]   ;;  %s719_s8 = inlined_call_operand.vmem [shape: f32[1,32], index: 8, kind: input, shape index: {}]   ;;  %s720_s9 = inlined_call_operand.vmem [shape: f32[1,32], index: 9, kind: input, shape index: {}]   ;;  %s721_s10 = inlined_call_operand.vmem [shape: f32[1,32], index: 10, kind: input, shape index: {}]   ;;  %s722_s11 = inlined_call_operand.vmem [shape: f32[1,32], index: 11, kind: input, shape index: {}]   ;;  %s723_s12 = inlined_call_operand.<no memory space> [shape: f32[1,1], index: 12, kind: input, shape index: {}]   ;;  %s724_s13 = inlined_call_operand.hbm [shape: f32[8,128], index: 13, kind: output, shape index: {}]  }
   0x1   :  { %20 = vsyncpa [#allocation7], 0 }
   0x2   :  { %21 = vsyncpa [#allocation10], 0 }
   0x3   :  { %22 = vsyncpa [#allocation5], 0  ;;  %s573_s25 = smov [#allocation6]  }
   0x4   :  { %s38_s26 = sshll.u32 %s573_s25, 4  ;;  %s39_s26 = int_to_ptr.vmem [resolvable:$true] %s38_s26 }
   0x5   :  { %s473_s27 = scalar_lea.vmem %s39_s26, 256  ;;  %p478_p1 = scmp.lt.s32.totalorder %s39_s26, %s39_s26 }
   0x6   :  { %p474_p0 = scmp.ne.s32.totalorder %s39_s26, %s473_s27  ;;  %p479_p2 = scmp.lt.s32.totalorder %s473_s27, %s473_s27 }
   0x8   :  { %p480_p3 = por %p479_p2, %p478_p1 }
   0xa   :  { %p481_p4 = pnand %p480_p3, %p474_p0 }
   0xc   :  { %484 = shalt.err (!%p481_p4)
}
   0xd   :  { %s574_s28 = smov 64   ;;  %s575_s29 = smov 4  }
   0xe   :  { %44 = dma.hbm_to_vmem [thread:$0]  %s712_s1, 256, %s39_s26, [#allocation7], %s574_s28, %s574_s28, %s575_s29  }
   0xf   :  { %s576_s15 = smov [#allocation3]   ;;  %s577_s17 = smov [#allocation8]  }
  0x10   :  { %s29_s16 = sshll.u32 %s576_s15, 4  ;;  %s52_s18 = sshll.u32 %s577_s17, 4  ;;  %s30_s16 = int_to_ptr.vmem [resolvable:$true] %s29_s16  ;;  %s53_s18 = int_to_ptr.vmem [resolvable:$true] %s52_s18 }
  0x11   :  { %s493_s19 = scalar_lea.vmem %s30_s16, 64  ;;  %p498_p6 = scmp.lt.s32.totalorder %s30_s16, %s30_s16 }
  0x12   :  { %p494_p5 = scmp.ne.s32.totalorder %s30_s16, %s493_s19  ;;  %p499_p7 = scmp.lt.s32.totalorder %s493_s19, %s493_s19 }
  0x14   :  { %p500_p8 = por %p499_p7, %p498_p6 }
  0x16   :  { %p501_p9 = pnand %p500_p8, %p494_p5 }
  0x18   :  { %504 = shalt.err (!%p501_p9)
}
  0x19   :  { %32 = dma.hbm_to_vmem [thread:$0]  %s711_s0, 64, %s30_s16, [#allocation4]  }
  0x1a   :  { %s513_s22 = scalar_lea.vmem %s53_s18, 256  ;;  %p518_p11 = scmp.lt.s32.totalorder %s53_s18, %s53_s18 }
  0x1b   :  { %p514_p10 = scmp.ne.s32.totalorder %s53_s18, %s513_s22  ;;  %p519_p12 = scmp.lt.s32.totalorder %s513_s22, %s513_s22 }
  0x1d   :  { %p520_p13 = por %p519_p12, %p518_p11 }
  0x1f   :  { %p521_p0 = pnand %p520_p13, %p514_p10 }
  0x21   :  { %524 = shalt.err (!%p521_p0)
}
  0x22   :  { %58 = dma.hbm_to_vmem [thread:$0]  %s714_s3, 256, %s53_s18, [#allocation7], %s574_s28, %s574_s28, %s575_s29  }
  0x23   :  { %s578_s24 = smov [#allocation9]  }
  0x24   :  { %s70_s25 = sshll.u32 %s578_s24, 4  ;;  %s71_s25 = int_to_ptr.vmem [resolvable:$true] %s70_s25 }
  0x25   :  { %s533_s26 = scalar_lea.vmem %s71_s25, 256  ;;  %p538_p2 = scmp.lt.s32.totalorder %s71_s25, %s71_s25 }
  0x26   :  { %p534_p1 = scmp.ne.s32.totalorder %s71_s25, %s533_s26  ;;  %p539_p3 = scmp.lt.s32.totalorder %s533_s26, %s533_s26 }
  0x28   :  { %p540_p4 = por %p539_p3, %p538_p2 }
  0x2a   :  { %p541_p5 = pnand %p540_p4, %p534_p1 }
  0x2c   :  { %544 = shalt.err (!%p541_p5)
}
  0x2d   :  { %76 = dma.hbm_to_vmem [thread:$0]  %s718_s7, 256, %s71_s25, [#allocation10], %s574_s28, %s574_s28, %s575_s29  }
  0x2e   :  { %565 = dma.done.wait [#allocation4], 64  }
  0x2f   :  { %566 = vsyncadd [#allocation4], 4294967232 }
  0x30   :  { %567 = dma.done.wait [#allocation7], 512  }
  0x31   :  { %568 = vsyncadd [#allocation7], 4294966784 }
  0x32   :  { %569 = dma.done.wait [#allocation10], 256  }
  0x33   :  { %570 = vsyncadd [#allocation10], 4294967040  ;;  %v579_v0 = vmov 0.0   ;;  %vm580_vm0 = vmmov 0   ;;  %v453_v1 = vld [vmem:[#allocation6 + $0x8] sm:$0xff]   ;;  %v454_v2 = vld [vmem:[#allocation6] sm:$0xff]   ;;  %v374_v62 = vstv %s723_s12 }
  0x34   :  { %420 = vmatprep.subr.bf16.mxu0 %v579_v0  ;;  %424 = vmatprep.mubr.msk.bf16.mxu0 %vm580_vm0, %v579_v0  ;;  %v100_v3 = vld [vmem:[#allocation3] sm:$0xf]  ;;  %vm124_vm1 = vcmask 261120   ;;  %v456_v5 = vld [vmem:[#allocation8] sm:$0xff]   ;;  %v457_v26 = vld [vmem:[#allocation9 + $0x8] sm:$0xff]  }
  0x35   :  { %428 = vmatprep.subr.bf16.mxu1 %v579_v0  ;;  %432 = vmatprep.mubr.msk.bf16.mxu1 %vm580_vm0, %v579_v0  ;;  %v455_v4 = vld [vmem:[#allocation8 + $0x8] sm:$0xff]   ;;  %v458_v27 = vld [vmem:[#allocation9] sm:$0xff]  }
  0x36   :  { %421 = vmatpush3.bf16.msra.mxu0 %v453_v1  ;;  %429 = vmatpush3.bf16.msra.mxu1 %v455_v4  ;;  %v394_v6 = vld [vmem:[%s713_s2] ss:$0 sm:$0xff] }
  0x37   :  { %422 = vmatprep.subr.bf16.mxu0 %v579_v0  ;;  %430 = vmatprep.subr.bf16.mxu1 %v579_v0  ;;  %v398_v14 = vld [vmem:[%s715_s4] ss:$0 sm:$0xff] }
  0x38   :  { %v402_v32 = vld [vmem:[%s716_s5] ss:$0 sm:$0xff] }
  0x39   :  { %v403_v34 = vld [vmem:[%s717_s6] ss:$0 sm:$0xff] }
  0x3a   :  { %423 = vmatpush3.bf16.msra.mxu0 %v454_v2  ;;  %431 = vmatpush3.bf16.msra.mxu1 %v456_v5  ;;  %v404_v38 = vld [vmem:[%s719_s8] ss:$0 sm:$0xff] }
  0x3b   :  { %436 = vmatprep.subr.bf16.mxu0 %v579_v0  ;;  %v408_v54 = vld [vmem:[%s720_s9] ss:$0 sm:$0xff]  ;;  %s581_s9 = smov [#allocation11]  }
  0x3c   :  { %v409_v56 = vld [vmem:[%s721_s10] ss:$0 sm:$0xff]  ;;  %s383_s22 = sshll.u32 %s581_s9, 4  ;;  %s384_s22 = int_to_ptr.vmem [resolvable:$true] %s383_s22 }
  0x3d   :  { %425 = vmatmul.mubr.msk.bf16.vlgmr.msra.gmra.mxu0 %vm124_vm1, %v100_v3  ;;  %v410_v58 = vld [vmem:[%s722_s11] ss:$0 sm:$0xff]  ;;  %s545_s10 = scalar_lea.vmem %s384_s22, 128  ;;  %p550_p7 = scmp.lt.s32.totalorder %s384_s22, %s384_s22 }
  0x3e   :  { %440 = vmatprep.mubr.msk.bf16.mxu0 %vm580_vm0, %v579_v0  ;;  %437 = vmatpush3.bf16.msra.mxu0 %v457_v26  ;;  %p546_p6 = scmp.ne.s32.totalorder %s384_s22, %s545_s10  ;;  %p551_p8 = scmp.lt.s32.totalorder %s545_s10, %s545_s10 }
  0x3f   :  { %438 = vmatprep.subr.bf16.mxu0 %v579_v0 }
  0x40   :  { %p552_p9 = por %p551_p8, %p550_p7 }
  0x42   :  { %439 = vmatpush3.bf16.msra.mxu0 %v458_v27  ;;  %p553_p10 = pnand %p552_p9, %p546_p6 }
  0xfd   :  { %v162_v7 = vpop.f32.mrf.mxu0 }
  0xfe   :  { %v163_v8 = vadd.f32 %v394_v6, %v162_v7 }
  0xff   :  { %v426_v9 = vpop.f32.mrf.mxu0 }
 0x100   :  { %459 = vtanh.f32 %v163_v8 }
 0x101   :  { %v165_v10 = vpop.f32.mrf.mxu0 }
 0x103   :  { %v427_v11 = vpop.f32.mrf.mxu0 }
 0x10d   :  { %v460_v12 = vpop.eup %459 }
 0x10e   :  { %v169_v13 = vpack.c.bf16 %v460_v12, %v460_v12 }
 0x110   :  { %433 = vmatmul.mubr.msk.bf16.vlgmr.msra.gmra.mxu1 %vm124_vm1, %v169_v13 }
 0x1d0   :  { %v230_v15 = vpop.f32.mrf.mxu1 }
 0x1d1   :  { %v231_v16 = vadd.f32 %v398_v14, %v230_v15 }
 0x1d2   :  { %v434_v17 = vpop.f32.mrf.mxu1 }
 0x1d3   :  { %v238_v18 = vsel %vm124_vm1, %v231_v16, 0.0 }
 0x1d4   :  { %239 = vadd.xlane.f32.xlu0 %v238_v18  ;;  %v233_v19 = vpop.f32.mrf.mxu1 }
 0x1d6   :  { %v435_v20 = vpop.f32.mrf.mxu1 }
 0x25d   :  { %v240_v21 = vpop.xlane.xlu0 %239 }
 0x25e   :  { %v242_v22 = vmul.f32 0.03125, %v240_v21 }
 0x260   :  { %v243_v23 = vsub.f32 %v231_v16, %v242_v22 }
 0x262   :  { %v244_v24 = vmul.f32 %v243_v23, %v243_v23 }
 0x264   :  { %v245_v25 = vsel %vm124_vm1, %v244_v24, 0.0 }
 0x265   :  { %246 = vadd.xlane.f32.xlu0 %v245_v25 }
 0x2ee   :  { %v247_v28 = vpop.xlane.xlu0 %246 }
 0x2ef   :  { %v248_v29 = vmul.f32 0.03125, %v247_v28 }
 0x2f1   :  { %v249_v30 = vadd.f32 1e-05, %v248_v29 }
 0x2f3   :  { %461 = vrsqrt.f32 %v249_v30 }
 0x300   :  { %v462_v31 = vpop.eup %461 }
 0x301   :  { %v251_v33 = vmul.f32 %v462_v31, %v243_v23 }
 0x303   :  { %v258_v35 = vmul.f32 %v402_v32, %v251_v33 }
 0x305   :  { %v265_v36 = vadd.f32 %v403_v34, %v258_v35 }
 0x307   :  { %v266_v37 = vpack.c.bf16 %v265_v36, %v265_v36 }
 0x309   :  { %441 = vmatmul.mubr.msk.bf16.vlgmr.msra.gmra.mxu0 %vm124_vm1, %v266_v37 }
 0x3c9   :  { %v327_v39 = vpop.f32.mrf.mxu0 }
 0x3ca   :  { %v328_v40 = vadd.f32 %v404_v38, %v327_v39 }
 0x3cb   :  { %v442_v41 = vpop.f32.mrf.mxu0 }
 0x3cc   :  { %v335_v42 = vsel %vm124_vm1, %v328_v40, 0.0 }
 0x3cd   :  { %336 = vadd.xlane.f32.xlu1 %v335_v42  ;;  %v330_v43 = vpop.f32.mrf.mxu0 }
 0x3cf   :  { %v443_v44 = vpop.f32.mrf.mxu0 }
 0x456   :  { %v337_v45 = vpop.xlane.xlu1 %336 }
 0x457   :  { %v338_v46 = vmul.f32 0.03125, %v337_v45 }
 0x459   :  { %v339_v47 = vsub.f32 %v328_v40, %v338_v46 }
 0x45b   :  { %v340_v48 = vmul.f32 %v339_v47, %v339_v47 }
 0x45d   :  { %v341_v49 = vsel %vm124_vm1, %v340_v48, 0.0 }
 0x45e   :  { %342 = vadd.xlane.f32.xlu1 %v341_v49 }
 0x4e7   :  { %v343_v50 = vpop.xlane.xlu1 %342 }
 0x4e8   :  { %v344_v51 = vmul.f32 0.03125, %v343_v50 }
 0x4ea   :  { %v345_v52 = vadd.f32 1e-05, %v344_v51 }
 0x4ec   :  { %463 = vrsqrt.f32 %v345_v52 }
 0x4f9   :  { %v464_v53 = vpop.eup %463 }
 0x4fa   :  { %v347_v55 = vmul.f32 %v464_v53, %v339_v47 }
 0x4fc   :  { %v354_v57 = vmul.f32 %v408_v54, %v347_v55 }
 0x4fe   :  { %v361_v59 = vadd.f32 %v409_v56, %v354_v57 }
 0x500   :  { %v369_v60 = vmul.f32 %v410_v58, %v361_v59 }
 0x502   :  { %v370_v61 = vsel %vm124_vm1, %v369_v60, 0.0 }
 0x503   :  { %371 = vadd.xlane.f32.xlu0 %v370_v61 }
 0x58c   :  { %v372_v63 = vpop.xlane.xlu0 %371 }
 0x58d   :  { %v375_v0 = vadd.f32 %v374_v62, %v372_v63 }
 0x58f   :  { %376 = vst [vmem:[#allocation11] sm:$0xff] %v375_v0 }
 0x590   :  { %556 = shalt.err (!%p553_p10)
}
 0x591   :  { %386 = dma.vmem_to_hbm [thread:$0]  %s384_s22, 128, %s724_s13, [#allocation5]  }
 0x592   :  { %571 = dma.done.wait [#allocation5], 128  }
 0x593   :  { %572 = vsyncadd [#allocation5], 4294967168 }
 0x594   :  { %390 = vsyncpa [#allocation4], 1 }
 0x595   :  { %391 = vsyncpa [#allocation7], 1 }
 0x596   :  { %392 = vsyncpa [#allocation10], 1 }
 0x597   :  { %393 = vsyncpa [#allocation5], 1 }

</bundles_post_ra>
